<compile_context>
chip_gen: v6e
topology: v6e:2x2x1
jax: 0.10.0
libtpu: 0.0.40
codegen_flags: <defaults>
</compile_context>

<pallas_src>
import functools
import math

import jax
import jax.numpy as jnp
from jax.experimental import pallas as pl
from jax.experimental.pallas import tpu as pltpu


# ----------------------------------------------------------------------------
# Helpers
# ----------------------------------------------------------------------------
def _round_up(x, m):
    return (x + m - 1) // m * m


def _pick_tm(m):
    if m <= 256:
        return m, m                       # single full-extent block, no pad
    for t in (256, 128):
        if m % t == 0:
            return t, m
    return 128, _round_up(m, 128)


def _pick_tn(n):
    if n <= 512:
        return n, n
    for t in (512, 256, 128):
        if n % t == 0:
            return t, n
    return 128, _round_up(n, 128)


def _pick_tk(k):
    if k <= 2048:
        return k, k                       # single K step, no reduction grid
    for t in (2048, 1024, 512, 256, 128):
        if k % t == 0:
            return t, k
    return 128, _round_up(k, 128)


# ----------------------------------------------------------------------------
# Pallas kernels
# ----------------------------------------------------------------------------
def _mm_epilogue_kernel(a_ref, b_ref, s_ref, *rest, relu, has_res):
    """Tiled MXU matmul with fused bias (folded BN) / residual / ReLU epilogue.

    grid = (M tiles, N tiles, K tiles); K is the innermost 'arbitrary' axis.
    bf16 inputs, f32 accumulator in VMEM scratch; the output tile is written
    only on the last K step.
    """
    if has_res:
        r_ref, o_ref, acc_ref = rest
    else:
        o_ref, acc_ref = rest

    @pl.when(pl.program_id(2) == 0)
    def _():
        acc_ref[...] = jnp.zeros_like(acc_ref)

    acc_ref[...] += jnp.dot(a_ref[...], b_ref[...],
                            preferred_element_type=jnp.float32)

    @pl.when(pl.program_id(2) == pl.num_programs(2) - 1)
    def _():
        y = acc_ref[...] + s_ref[...].astype(jnp.float32)
        if has_res:
            y = y + r_ref[...].astype(jnp.float32)
        if relu:
            y = jnp.maximum(y, 0.0)
        o_ref[...] = y.astype(o_ref.dtype)


def _maxpool_kernel(p_ref, o_ref):
    # p_ref: (rows_tile, k*k, C) -> max over the window axis
    o_ref[...] = jnp.max(p_ref[...], axis=1)


def _avgpool_kernel(x_ref, o_ref):
    # x_ref: (B, H*W, C) bf16 -> f32 mean over the spatial axis
    o_ref[...] = jnp.mean(x_ref[...].astype(jnp.float32), axis=1)


# ----------------------------------------------------------------------------
# Fused matmul wrapper (conv-as-matmul + BN-bias + residual + ReLU epilogue)
# ----------------------------------------------------------------------------
def matmul_fused(a, b, bias, residual=None, relu=False,
                 out_dtype=jnp.bfloat16):
    """a:(M,K), b:(K,N) [bf16 weights], bias:(N,) f32, residual:(M,N)|None."""
    M, K = a.shape
    K2, N = b.shape
    assert K == K2
    tm, Mp = _pick_tm(M)
    tn, Np = _pick_tn(N)
    tk, Kp = _pick_tk(K)

    a = a.astype(jnp.bfloat16)
    b = b.astype(jnp.bfloat16)
    if (Mp, Kp) != (M, K):
        a = jnp.pad(a, ((0, Mp - M), (0, Kp - K)))
    if (Kp, Np) != (K, N):
        b = jnp.pad(b, ((0, Kp - K), (0, Np - N)))
    bias2 = bias.reshape(1, N).astype(jnp.float32)
    if Np != N:
        bias2 = jnp.pad(bias2, ((0, 0), (0, Np - N)))

    inputs = [a, b, bias2]
    in_specs = [pl.BlockSpec((tm, tk), lambda i, j, k: (i, k)),
                pl.BlockSpec((tk, tn), lambda i, j, k: (k, j)),
                pl.BlockSpec((1, tn), lambda i, j, k: (0, j))]
    if residual is not None:
        r = residual
        if r.shape != (Mp, Np):
            r = jnp.pad(r, ((0, Mp - r.shape[0]), (0, Np - r.shape[1])))
        inputs.append(r)
        in_specs.append(pl.BlockSpec((tm, tn), lambda i, j, k: (i, j)))

    kern = functools.partial(_mm_epilogue_kernel, relu=relu,
                             has_res=residual is not None)
    out = pl.pallas_call(
        kern,
        out_shape=jax.ShapeDtypeStruct((Mp, Np), out_dtype),
        grid_spec=pltpu.PrefetchScalarGridSpec(
            num_scalar_prefetch=0,
            grid=(Mp // tm, Np // tn, Kp // tk),
            in_specs=in_specs,
            out_specs=pl.BlockSpec((tm, tn), lambda i, j, k: (i, j)),
            scratch_shapes=[pltpu.VMEM((tm, tn), jnp.float32)]),
        compiler_params=pltpu.CompilerParams(
            dimension_semantics=("parallel", "parallel", "arbitrary")),
    )(*inputs)
    if (Mp, Np) != (M, N):
        out = out[:M, :N]
    return out


# ----------------------------------------------------------------------------
# Layer wrappers (thin JAX glue around the Pallas kernels)
# ----------------------------------------------------------------------------
@functools.partial(jax.jit,
                   static_argnames=("kh", "kw", "stride", "padding", "relu"))
def conv2d_fused(x, w_mat, bias, residual=None, *, kh, kw, stride, padding,
                 relu):
    """x: NHWC bf16, w_mat: (kh*kw*Cin, Cout) bf16 (BN already folded),
    bias: (Cout,) f32.  Optional fused residual-add (+ReLU) epilogue."""
    B, H, W, C = x.shape
    Ho = (H + 2 * padding - kh) // stride + 1
    Wo = (W + 2 * padding - kw) // stride + 1
    if kh == 1 and kw == 1 and padding == 0:
        xs = x[:, ::stride, ::stride, :] if stride != 1 else x
        a = xs.reshape(B * Ho * Wo, C)
    else:
        xp = jnp.pad(x, ((0, 0), (padding, padding),
                         (padding, padding), (0, 0)))
        cols = []
        for i in range(kh):
            for j in range(kw):
                cols.append(xp[:, i:i + stride * Ho:stride,
                               j:j + stride * Wo:stride, :])
        a = jnp.concatenate(cols, axis=-1).reshape(B * Ho * Wo, kh * kw * C)
    r2 = None
    if residual is not None:
        r2 = residual.reshape(B * Ho * Wo, residual.shape[-1])
    cout = w_mat.shape[1]
    y = matmul_fused(a, w_mat, bias, residual=r2, relu=relu,
                     out_dtype=jnp.bfloat16)
    return y.reshape(B, Ho, Wo, cout)


@jax.jit
def maxpool_3x3_s2_p1(x4):
    B, H, W, C = x4.shape
    k, stride, padding = 3, 2, 1
    Ho = (H + 2 * padding - k) // stride + 1
    Wo = (W + 2 * padding - k) // stride + 1
    xp = jnp.pad(x4, ((0, 0), (padding, padding), (padding, padding), (0, 0)),
                 constant_values=-jnp.inf)
    wins = []
    for i in range(k):
        for j in range(k):
            wins.append(xp[:, i:i + stride * Ho:stride,
                           j:j + stride * Wo:stride, :])
    rows = B * Ho * Wo
    p = jnp.stack(wins, axis=3).reshape(rows, k * k, C)
    tr = rows if rows <= 512 else 512
    rows_p = _round_up(rows, tr)
    if rows_p != rows:
        p = jnp.pad(p, ((0, rows_p - rows), (0, 0), (0, 0)))
    y = pl.pallas_call(
        _maxpool_kernel,
        out_shape=jax.ShapeDtypeStruct((rows_p, C), x4.dtype),
        grid_spec=pltpu.PrefetchScalarGridSpec(
            num_scalar_prefetch=0,
            grid=(rows_p // tr,),
            in_specs=[pl.BlockSpec((tr, k * k, C), lambda i: (i, 0, 0))],
            out_specs=pl.BlockSpec((tr, C), lambda i: (i, 0))),
        compiler_params=pltpu.CompilerParams(
            dimension_semantics=("parallel",)),
    )(p)
    return y[:rows].reshape(B, Ho, Wo, C)


@jax.jit
def global_avg_pool(x4):
    """AdaptiveAvgPool2d((1,1)) + flatten -> (B, C) f32."""
    B, H, W, C = x4.shape
    x3 = x4.reshape(B, H * W, C)
    return pl.pallas_call(
        _avgpool_kernel,
        out_shape=jax.ShapeDtypeStruct((B, C), jnp.float32),
    )(x3)


@jax.jit
def linear_fc(feats, w_mat, bias):
    """feats:(B,F), w_mat:(F,Npad) bf16, bias:(Npad,) f32 -> (B,Npad) f32."""
    return matmul_fused(feats, w_mat, bias, relu=False, out_dtype=jnp.float32)


# ----------------------------------------------------------------------------
# ResNet-152 (bottleneck blocks 3/8/36/3, expansion 4), BN folded at init
# ----------------------------------------------------------------------------
BLOCKS = [(64, 3, 1), (128, 8, 2), (256, 36, 2), (512, 3, 2)]
EXPANSION = 4
BN_EPS = 1e-5

_KEY = jax.random.PRNGKey(0)
_KCOUNT = [0]


def _next_key():
    _KCOUNT[0] += 1
    return jax.random.fold_in(_KEY, _KCOUNT[0])


def init_conv_bn(cout, cin, kh, kw):
    """Random conv + eval-mode BN params, folded into (w_mat bf16, bias f32)."""
    fan_in = cin * kh * kw
    w = jax.random.normal(_next_key(), (cout, cin, kh, kw),
                          jnp.float32) * (1.0 / math.sqrt(fan_in))
    gamma = 1.0 + 0.1 * jax.random.normal(_next_key(), (cout,), jnp.float32)
    beta = 0.1 * jax.random.normal(_next_key(), (cout,), jnp.float32)
    mean = 0.1 * jax.random.normal(_next_key(), (cout,), jnp.float32)
    var = 1.0 + 0.1 * jnp.abs(
        jax.random.normal(_next_key(), (cout,), jnp.float32))
    scale = gamma / jnp.sqrt(var + BN_EPS)
    w_f = w * scale[:, None, None, None]
    b_f = beta - mean * scale
    w_mat = jnp.transpose(w_f, (2, 3, 1, 0)).reshape(
        kh * kw * cin, cout).astype(jnp.bfloat16)
    return {"w": w_mat, "b": b_f.astype(jnp.float32)}


def init_params(num_classes):
    params = {"stem": init_conv_bn(64, 3, 7, 7)}
    inplanes = 64
    layers = []
    for planes, nblocks, lstride in BLOCKS:
        blocks = []
        for bi in range(nblocks):
            s = lstride if bi == 0 else 1
            blk = {
                "conv1": init_conv_bn(planes, inplanes, 1, 1),
                "conv2": init_conv_bn(planes, planes, 3, 3),
                "conv3": init_conv_bn(planes * EXPANSION, planes, 1, 1),
            }
            if s != 1 or inplanes != planes * EXPANSION:
                blk["down"] = init_conv_bn(planes * EXPANSION, inplanes, 1, 1)
            blocks.append(blk)
            inplanes = planes * EXPANSION
        layers.append(blocks)
    params["layers"] = layers

    in_features = 512 * EXPANSION               # 2048 = resnet152 fc.in_features
    n_pad = max(_round_up(num_classes, 128), 128)
    fc_w = jax.random.normal(_next_key(), (num_classes, in_features),
                             jnp.float32) * (1.0 / math.sqrt(in_features))
    fc_b = 0.01 * jax.random.normal(_next_key(), (num_classes,), jnp.float32)
    w_mat = jnp.zeros((in_features, n_pad), jnp.float32)
    w_mat = w_mat.at[:, :num_classes].set(fc_w.T).astype(jnp.bfloat16)
    b_pad = jnp.zeros((n_pad,), jnp.float32).at[:num_classes].set(fc_b)
    params["fc"] = {"w": w_mat, "b": b_pad}
    return params


def bottleneck(x, p, stride):
    if "down" in p:
        identity = conv2d_fused(x, p["down"]["w"], p["down"]["b"],
                                kh=1, kw=1, stride=stride, padding=0,
                                relu=False)
    else:
        identity = x
    out = conv2d_fused(x, p["conv1"]["w"], p["conv1"]["b"],
                       kh=1, kw=1, stride=1, padding=0, relu=True)
    out = conv2d_fused(out, p["conv2"]["w"], p["conv2"]["b"],
                       kh=3, kw=3, stride=stride, padding=1, relu=True)
    # conv3 + folded bn3 + residual add + ReLU, all in one matmul epilogue.
    out = conv2d_fused(out, p["conv3"]["w"], p["conv3"]["b"],
                       residual=identity,
                       kh=1, kw=1, stride=1, padding=0, relu=True)
    return out


def custom_resnet152_forward(params, x_nchw, num_classes):
    """Equivalent of CustomResNet152.forward (eval mode)."""
    x = jnp.transpose(x_nchw, (0, 2, 3, 1)).astype(jnp.bfloat16)  # NCHW->NHWC
    x = conv2d_fused(x, params["stem"]["w"], params["stem"]["b"],
                     kh=7, kw=7, stride=2, padding=3, relu=True)
    x = maxpool_3x3_s2_p1(x)
    for (planes, nblocks, lstride), blocks in zip(BLOCKS, params["layers"]):
        for bi, blk in enumerate(blocks):
            s = lstride if bi == 0 else 1
            x = bottleneck(x, blk, s)
    feats = global_avg_pool(x)                     # (B, 2048); fc = Identity
    logits = linear_fc(feats, params["fc"]["w"], params["fc"]["b"])
    return logits[:, :num_classes]


# ----------------------------------------------------------------------------
if __name__ == "__main__":
    num_classes = 10
    params = init_params(num_classes)

    # Small input consistent with the module: NCHW, 3 input channels.
    x = jax.random.normal(jax.random.PRNGKey(0), (2, 3, 32, 32), jnp.float32)

    logits = custom_resnet152_forward(params, x, num_classes)
    logits = jax.block_until_ready(logits)

    assert logits.shape == (2, num_classes)
    assert bool(jnp.all(jnp.isfinite(logits)))
    print("KERNEL_OK")
</pallas_src>

<mosaic_0001>
module attributes {stable_mosaic.version = 11 : i64} {
  func.func @_mm_epilogue_kernel(%arg0: i32, %arg1: i32, %arg2: i32, %arg3: memref<256x147xbf16, #tpu.memory_space<vmem>>, %arg4: memref<147x64xbf16, #tpu.memory_space<vmem>>, %arg5: memref<1x64xf32, #tpu.memory_space<vmem>>, %arg6: memref<256x64xbf16, #tpu.memory_space<vmem>>, %arg7: memref<256x64xf32, #tpu.memory_space<vmem>>) attributes {dimension_semantics = [#tpu.dimension_semantics<parallel>, #tpu.dimension_semantics<parallel>, #tpu.dimension_semantics<arbitrary>], iteration_bounds = array<i64: 2, 1, 1>, scalar_prefetch = 0 : i64, scratch_operands = 1 : i64, tpu.core_type = #tpu.core_type<tc>, window_params = [{transform_indices = @transform_0, window_bounds = array<i64: 256, 147>}, {transform_indices = @transform_1, window_bounds = array<i64: 147, 64>}, {transform_indices = @transform_2, window_bounds = array<i64: 1, 64>}, {transform_indices = @transform_3, window_bounds = array<i64: 256, 64>}]} {
    %c0_i32 = arith.constant 0 : i32
    %0 = arith.cmpi eq, %arg2, %c0_i32 : i32
    %1 = arith.extui %0 : i1 to i32
    %c0_i32_0 = arith.constant 0 : i32
    %2 = arith.cmpi ne, %1, %c0_i32_0 : i32
    scf.if %2 {
      %cst_10 = arith.constant 0.000000e+00 : f32
      %12 = vector.broadcast %cst_10 : f32 to vector<256x64xf32>
      %c0_11 = arith.constant 0 : index
      %c0_12 = arith.constant 0 : index
      %13 = vector.load %arg7[%c0_11, %c0_12] : memref<256x64xf32, #tpu.memory_space<vmem>>, vector<256x64xf32>
      tpu.vector_store %arg7[%c0_11, %c0_12], %12 {strides = array<i32>} : memref<256x64xf32, #tpu.memory_space<vmem>>, vector<256x64xf32>,
    } else {
    }
    %c0 = arith.constant 0 : index
    %c0_1 = arith.constant 0 : index
    %3 = vector.load %arg7[%c0, %c0_1] : memref<256x64xf32, #tpu.memory_space<vmem>>, vector<256x64xf32>
    %c0_2 = arith.constant 0 : index
    %c0_3 = arith.constant 0 : index
    %4 = vector.load %arg3[%c0_2, %c0_3] : memref<256x147xbf16, #tpu.memory_space<vmem>>, vector<256x147xbf16>
    %c0_4 = arith.constant 0 : index
    %c0_5 = arith.constant 0 : index
    %5 = vector.load %arg4[%c0_4, %c0_5] : memref<147x64xbf16, #tpu.memory_space<vmem>>, vector<147x64xbf16>
    %cst = arith.constant dense<0.000000e+00> : vector<256x64xf32>
    %6 = tpu.matmul %4, %5, %cst {dimension_numbers = #tpu.dot_dimension_numbers<[1], [0], [0], [1], [0, 0, 1, 1], [], []>} : vector<256x147xbf16>, vector<147x64xbf16>, vector<256x64xf32> -> vector<256x64xf32>
    %7 = arith.addf %3, %6 : vector<256x64xf32>
    %c0_6 = arith.constant 0 : index
    %c0_7 = arith.constant 0 : index
    %8 = vector.load %arg7[%c0_6, %c0_7] : memref<256x64xf32, #tpu.memory_space<vmem>>, vector<256x64xf32>
    tpu.vector_store %arg7[%c0_6, %c0_7], %7 {strides = array<i32>} : memref<256x64xf32, #tpu.memory_space<vmem>>, vector<256x64xf32>,
    %c0_i32_8 = arith.constant 0 : i32
    %9 = arith.cmpi eq, %arg2, %c0_i32_8 : i32
    %10 = arith.extui %9 : i1 to i32
    %c0_i32_9 = arith.constant 0 : i32
    %11 = arith.cmpi ne, %10, %c0_i32_9 : i32
    scf.if %11 {
      %c0_10 = arith.constant 0 : index
      %c0_11 = arith.constant 0 : index
      %12 = vector.load %arg7[%c0_10, %c0_11] : memref<256x64xf32, #tpu.memory_space<vmem>>, vector<256x64xf32>
      %c0_12 = arith.constant 0 : index
      %c0_13 = arith.constant 0 : index
      %13 = vector.load %arg5[%c0_12, %c0_13] : memref<1x64xf32, #tpu.memory_space<vmem>>, vector<1x64xf32>
      %14 = vector.broadcast %13 : vector<1x64xf32> to vector<256x64xf32>
      %15 = arith.addf %12, %14 : vector<256x64xf32>
      %cst_14 = arith.constant 0.000000e+00 : f32
      %16 = vector.broadcast %cst_14 : f32 to vector<256x64xf32>
      %17 = arith.maximumf %15, %16 : vector<256x64xf32>
      %18 = arith.truncf %17 : vector<256x64xf32> to vector<256x64xbf16>
      %c0_15 = arith.constant 0 : index
      %c0_16 = arith.constant 0 : index
      %19 = vector.load %arg6[%c0_15, %c0_16] : memref<256x64xbf16, #tpu.memory_space<vmem>>, vector<256x64xbf16>
      tpu.vector_store %arg6[%c0_15, %c0_16], %18 {strides = array<i32>} : memref<256x64xbf16, #tpu.memory_space<vmem>>, vector<256x64xbf16>,
    } else {
    }
    return
  }
  func.func @transform_0(%arg0: i32, %arg1: i32, %arg2: i32) -> (i32, i32) {
    %c0_i32 = arith.constant 0 : i32
    return %arg0, %arg2 : i32, i32
  }
  func.func @transform_1(%arg0: i32, %arg1: i32, %arg2: i32) -> (i32, i32) {
    %c0_i32 = arith.constant 0 : i32
    return %arg2, %arg1 : i32, i32
  }
  func.func @transform_2(%arg0: i32, %arg1: i32, %arg2: i32) -> (i32, i32) {
    %c0_i32 = arith.constant 0 : i32
    %c0_i32_0 = arith.constant 0 : i32
    return %c0_i32, %arg1 : i32, i32
  }
  func.func @transform_3(%arg0: i32, %arg1: i32, %arg2: i32) -> (i32, i32) {
    %c0_i32 = arith.constant 0 : i32
    return %arg0, %arg1 : i32, i32
  }
}

</mosaic_0001>

<bundles_post_ra>
// kernel: conv2d_fused.1
= control target key start
LH: loop header
LB: loop body
LE: loop exit
PB: predicated region body
PF: predicated region fallthrough
CT: control target
= control target key end

     0   :  { %8 = vsyncpa [#allocation4], 0  ;;  %s2029_s0 = inlined_call_operand.vmem [shape: bf16[512,147], index: 0, kind: input, shape index: {}]   ;;  %s2030_s1 = inlined_call_operand.vmem [shape: bf16[147,64], index: 1, kind: input, shape index: {}]   ;;  %s2031_s2 = inlined_call_operand.vmem [shape: f32[1,64], index: 2, kind: input, shape index: {}]   ;;  %s2032_s3 = inlined_call_operand.hbm [shape: bf16[512,64], index: 3, kind: output, shape index: {}]  }
   0x1   :  { %10 = vsyncpa [#allocation4 + $0x1], 0  ;;  %s1639_s12 = smov 0   ;;  %s1641_s13 = smov 0  }
   0x2   :  { %s1643_s14 = smov 0   ;;  %s1645_s15 = smov 0  }
   0x3   :  { %s1647_s16 = smov 0   ;;  %s1649_s17 = smov 0  }
   0x4 LB: > { %s1256_s18 = sadd.s32 4294967295, %s1611_s17   ;;  %s1257_s19 = sadd.s32 4294967294, %s1611_s17   ;;  %s1611_s17 = sphi %s1649_s17, %s16_s17   ;;  %s1607_s16 = sphi %s1647_s16, %s2039_s16   ;;  %s1603_s15 = sphi %s1645_s15, %s2038_s15   ;;  %s1599_s14 = sphi %s1643_s14, %s2037_s14   ;;  %s1595_s13 = sphi %s1641_s13, %s2036_s13   ;;  %s1591_s12 = sphi %s1639_s12, %s2035_s12  }
   0x5   : > { %s35_s20 = sadd.s32 1, %s1607_s16  ;;  %s126_s21 = sadd.s32 1, %s1599_s14 }
   0x6   : > { %p37_p0 = scmp.ge.s32.totalorder %s35_s20, 2  ;;  %p136_p1 = scmp.ne.s32.totalorder %s1599_s14, %s1595_s13 }
   0x7   : > { %p137_p2 = scmp.eq.s32.totalorder %s1256_s18, 1  ;;  %p142_p3 = scmp.ne.s32.totalorder %s1595_s13, %s1591_s12 }
   0x8   : > { %s2041_s20 = smov (%p37_p0, %s35_s20), 0  ;;  %p143_p5 = scmp.eq.s32.totalorder %s1257_s19, 1 }
   0x9   : > { %p1679_p4 = por %p137_p2, %p136_p1  ;;  %s121_s23 = ssub.s32 %s1607_s16, %s2041_s20 }
   0xa   : > { %p1262_p6 = scmp.ge.s32.totalorder %s1611_s17, 1  ;;  %p124_p7 = scmp.eq.s32.totalorder %s121_s23, 0 }
   0xb   : > { %p1686_p8 = por %p143_p5, %p142_p3  ;;  %p194_p9 = scmp.lt.s32.totalorder %s1611_s17, 3 }
   0xc   : > { %s1692_s25 = scalar_select %p124_p7, %s1599_s14, %s126_s21  }
   0xd   : > { %p195_p10 = pnand %p1262_p6, %p194_p9 }
   0xe   : > { %s1264_s5 = sshll.u32 (!%p195_p10), %s1603_s15, 5  ;;  %s231_s7 = sand.u32 (!%p195_p10), 1, %s1595_s13  }
   0xf   : > { %198 = sbr.rel (%p195_p10) target bundleno = 345 (0x159), region = 32  ;;  %p236_p11 = scmp.lt.s32.totalorder (!%p195_p10), %s1264_s5, 63 }
  0x10   : > { %s1263_s10 = sshll.u32 (!%p195_p10), %s231_s7, 7  ;;  %s1396_s18 = sshll.u32 (!%p195_p10), %s1603_s15, 11 }
  0x11   : > { %s1974_s26 = scalar_lea.hbm (!%p195_p10), %s2032_s3, %s1396_s18  ;;  %s1984_s15 = scalar_lea.sflag (!%p195_p10), [#allocation4], %s231_s7 }
  0x12   : > { %s1616_s28 = smov (!%p195_p10), [#allocation3]  }
  0x13   : > { %s1539_s29 = sshll.u32 (!%p195_p10), %s1616_s28, 4  ;;  %s1540_s29 = int_to_ptr.vmem [resolvable:$false] %s1539_s29 }
  0x14   : > { %v1477_v0 = vld [vmem:[%s2030_s1 + $0x38] sm:$0xff]   ;;  %v1613_v1 = vmov 0   ;;  %v1478_v2 = vld [vmem:[%s2030_s1 + $0x30] sm:$0xff]   ;;  %v1479_v3 = vld [vmem:[%s2030_s1 + $0x28] sm:$0xff]   ;;  %s2043_s5 = smov (!%p236_p11, %s1264_s5), 63  ;;  %vm264_vm0 = vcmask 523264  }
  0x15   : > { %637 = vmatprep.subr.bf16.mxu0 %v1613_v1  ;;  %1397 = vmatprep.subr.bf16.mxu1 %v1613_v1  ;;  %v1480_v4 = vld [vmem:[%s2030_s1 + $0x20] sm:$0xff]   ;;  %s1363_s8 = sshll.u32 %s2043_s5, 3  ;;  %v1614_v5 = vmov 0.0   ;;  %v1481_v6 = vld [vmem:[%s2030_s1 + $0x18] sm:$0xff]   ;;  %vm581_vm1 = vcmask 154624   ;;  %v1482_v9 = vld [vmem:[%s2030_s1 + $0x10] sm:$0xff]  }
  0x16   : > { %638 = vmatpush1.bf16.msra.mxu0 %v1477_v0  ;;  %1407 = vmatpush1.bf16.msra.mxu1 %v1477_v0  ;;  %265 = vst.msk [vmem:[#allocation2] sm:$0xff] %vm264_vm0, %v1614_v5  ;;  %266 = vst.msk [vmem:[#allocation2 + $0x8] sm:$0xff] %vm264_vm0, %v1614_v5  ;;  %s1755_s11 = scalar_lea.vmem %s2029_s0, %s1363_s8  ;;  %vm630_vm2 = vcmask 1040384   ;;  %v1483_v10 = vld [vmem:[%s2030_s1 + $0x8] sm:$0xff]   ;;  %vm631_vm3 = vcmask 1041408   ;;  %v1615_v11 = vmov 65535  }
  0x17   : > { %639 = vmatprep.subr.bf16.mxu0 %v1613_v1  ;;  %1398 = vmatprep.subr.bf16.mxu1 %v1613_v1  ;;  %267 = vst.msk [vmem:[#allocation2 + $0x10] sm:$0xff] %vm264_vm0, %v1614_v5  ;;  %268 = vst.msk [vmem:[#allocation2 + $0x18] sm:$0xff] %vm264_vm0, %v1614_v5  ;;  %v1489_v7 = vld [vmem:[%s1755_s11 + $0x4] ss:$8 sps:$4 sm:$0xff]   ;;  %v632_v12 = vsel %vm630_vm2, 4294967295, %v1615_v11  ;;  %vm1097_vm4 = vcmask 519168  }
  0x18   : > { %269 = vst.msk [vmem:[#allocation2 + $0x20] sm:$0xff] %vm264_vm0, %v1614_v5  ;;  %270 = vst.msk [vmem:[#allocation2 + $0x28] sm:$0xff] %vm264_vm0, %v1614_v5  ;;  %v1492_v8 = vld [vmem:[%s1755_s11 + $0x84] ss:$8 sps:$4 sm:$0xff]   ;;  %1309 = vmatprep.mubr.msk.bf16.mxu0 %vm581_vm1, %v1489_v7  ;;  %v633_v15 = vsel %vm631_vm3, %v632_v12, 0  ;;  %s1541_s30 = scalar_lea.vmem %s1540_s29, 4096 }
  0x19   : > { %271 = vst.msk [vmem:[#allocation2 + $0x30] sm:$0xff] %vm264_vm0, %v1614_v5  ;;  %272 = vst.msk [vmem:[#allocation2 + $0x38] sm:$0xff] %vm264_vm0, %v1614_v5  ;;  %1317 = vmatprep.mubr.msk.bf16.mxu1 %vm581_vm1, %v1492_v8  ;;  %v1484_v13 = vld [vmem:[%s2030_s1] sm:$0xff]   ;;  %v1485_v14 = vld [vmem:[%s2030_s1 + $0x48] ss:$0 sps:$4 sm:$0x33]  }
  0x1a   : > { %640 = vmatpush1.bf16.msra.mxu0 %v1478_v2  ;;  %1408 = vmatpush1.bf16.msra.mxu1 %v1478_v2  ;;  %273 = vst.msk [vmem:[#allocation2 + $0x40] sm:$0xff] %vm264_vm0, %v1614_v5  ;;  %274 = vst.msk [vmem:[#allocation2 + $0x48] sm:$0xff] %vm264_vm0, %v1614_v5  ;;  %v635_v16 = vand.u32 %v1485_v14, %v633_v15  ;;  %v1486_v17 = vld [vmem:[%s2030_s1 + $0x40] sm:$0xff]   ;;  %v1493_v20 = vld [vmem:[%s1755_s11 + $0x14] ss:$8 sps:$4 sm:$0xff]  }
  0x1b   : > { %641 = vmatprep.subr.bf16.mxu0 %v1613_v1  ;;  %1399 = vmatprep.subr.bf16.mxu1 %v1613_v1  ;;  %275 = vst.msk [vmem:[#allocation2 + $0x50] sm:$0xff] %vm264_vm0, %v1614_v5  ;;  %276 = vst.msk [vmem:[#allocation2 + $0x58] sm:$0xff] %vm264_vm0, %v1614_v5  ;;  %v1487_v18 = vld [vmem:[%s1755_s11] ss:$8 sps:$4 sm:$0xff]   ;;  %v1495_v21 = vld [vmem:[%s1755_s11 + $0x94] ss:$8 sps:$4 sm:$0xff]  }
  0x1c   : > { %277 = vst.msk [vmem:[#allocation2 + $0x60] sm:$0xff] %vm264_vm0, %v1614_v5  ;;  %278 = vst.msk [vmem:[#allocation2 + $0x68] sm:$0xff] %vm264_vm0, %v1614_v5  ;;  %v1490_v19 = vld [vmem:[%s1755_s11 + $0x80] ss:$8 sps:$4 sm:$0xff]   ;;  %v1497_v22 = vld [vmem:[%s1755_s11 + $0x10] ss:$8 sps:$4 sm:$0xff]  }
  0x1d   : > { %279 = vst.msk [vmem:[#allocation2 + $0x70] sm:$0xff] %vm264_vm0, %v1614_v5  ;;  %280 = vst.msk [vmem:[#allocation2 + $0x78] sm:$0xff] %vm264_vm0, %v1614_v5  ;;  %v1498_v23 = vld [vmem:[%s1755_s11 + $0x90] ss:$8 sps:$4 sm:$0xff]   ;;  %v1499_v24 = vld [vmem:[%s1755_s11 + $0x24] ss:$8 sps:$4 sm:$0xff]  }
  0x1e   : > { %642 = vmatpush1.bf16.msra.mxu0 %v1479_v3  ;;  %1409 = vmatpush1.bf16.msra.mxu1 %v1479_v3  ;;  %281 = vst.msk [vmem:[#allocation2 + $0x80] sm:$0xff] %vm264_vm0, %v1614_v5  ;;  %282 = vst.msk [vmem:[#allocation2 + $0x88] sm:$0xff] %vm264_vm0, %v1614_v5  ;;  %v1501_v25 = vld [vmem:[%s1755_s11 + $0xa4] ss:$8 sps:$4 sm:$0xff]   ;;  %v1503_v26 = vld [vmem:[%s1755_s11 + $0x20] ss:$8 sps:$4 sm:$0xff]  }
  0x1f   : > { %643 = vmatprep.subr.bf16.mxu0 %v1613_v1  ;;  %1400 = vmatprep.subr.bf16.mxu1 %v1613_v1  ;;  %283 = vst.msk [vmem:[#allocation2 + $0x90] sm:$0xff] %vm264_vm0, %v1614_v5  ;;  %284 = vst.msk [vmem:[#allocation2 + $0x98] sm:$0xff] %vm264_vm0, %v1614_v5  ;;  %v1504_v27 = vld [vmem:[%s1755_s11 + $0xa0] ss:$8 sps:$4 sm:$0xff]   ;;  %v1505_v28 = vld [vmem:[%s1755_s11 + $0x34] ss:$8 sps:$4 sm:$0xff]  }
  0x20   : > { %285 = vst.msk [vmem:[#allocation2 + $0xa0] sm:$0xff] %vm264_vm0, %v1614_v5  ;;  %286 = vst.msk [vmem:[#allocation2 + $0xa8] sm:$0xff] %vm264_vm0, %v1614_v5  ;;  %v1507_v29 = vld [vmem:[%s1755_s11 + $0xb4] ss:$8 sps:$4 sm:$0xff]   ;;  %v1509_v30 = vld [vmem:[%s1755_s11 + $0x30] ss:$8 sps:$4 sm:$0xff]  }
  0x21   : > { %287 = vst.msk [vmem:[#allocation2 + $0xb0] sm:$0xff] %vm264_vm0, %v1614_v5  ;;  %288 = vst.msk [vmem:[#allocation2 + $0xb8] sm:$0xff] %vm264_vm0, %v1614_v5  ;;  %v1510_v31 = vld [vmem:[%s1755_s11 + $0xb0] ss:$8 sps:$4 sm:$0xff]   ;;  %v1511_v32 = vld [vmem:[%s1755_s11 + $0x44] ss:$8 sps:$4 sm:$0xff]  }
  0x22   : > { %289 = vst.msk [vmem:[#allocation2 + $0xc0] sm:$0xff] %vm264_vm0, %v1614_v5  ;;  %290 = vst.msk [vmem:[#allocation2 + $0xc8] sm:$0xff] %vm264_vm0, %v1614_v5  ;;  %644 = vmatpush1.bf16.msra.mxu0 %v1480_v4  ;;  %1410 = vmatpush1.bf16.msra.mxu1 %v1480_v4  ;;  %v1513_v33 = vld [vmem:[%s1755_s11 + $0xc4] ss:$8 sps:$4 sm:$0xff]   ;;  %v1515_v34 = vld [vmem:[%s1755_s11 + $0x40] ss:$8 sps:$4 sm:$0xff]  }
  0x23   : > { %291 = vst.msk [vmem:[#allocation2 + $0xd0] sm:$0xff] %vm264_vm0, %v1614_v5  ;;  %292 = vst.msk [vmem:[#allocation2 + $0xd8] sm:$0xff] %vm264_vm0, %v1614_v5  ;;  %645 = vmatprep.subr.bf16.mxu0 %v1613_v1  ;;  %1401 = vmatprep.subr.bf16.mxu1 %v1613_v1  ;;  %v1516_v35 = vld [vmem:[%s1755_s11 + $0xc0] ss:$8 sps:$4 sm:$0xff]   ;;  %v1517_v36 = vld [vmem:[%s1755_s11 + $0x54] ss:$8 sps:$4 sm:$0xff]  }
  0x24   : > { %293 = vst.msk [vmem:[#allocation2 + $0xe0] sm:$0xff] %vm264_vm0, %v1614_v5  ;;  %294 = vst.msk [vmem:[#allocation2 + $0xe8] sm:$0xff] %vm264_vm0, %v1614_v5  ;;  %v1519_v37 = vld [vmem:[%s1755_s11 + $0xd4] ss:$8 sps:$4 sm:$0xff]   ;;  %v1521_v38 = vld [vmem:[%s1755_s11 + $0x50] ss:$8 sps:$4 sm:$0xff]  }
  0x25   : > { %295 = vst.msk [vmem:[#allocation2 + $0xf0] sm:$0xff] %vm264_vm0, %v1614_v5  ;;  %296 = vst.msk [vmem:[#allocation2 + $0xf8] sm:$0xff] %vm264_vm0, %v1614_v5  ;;  %v1522_v39 = vld [vmem:[%s1755_s11 + $0xd0] ss:$8 sps:$4 sm:$0xff]   ;;  %v1523_v40 = vld [vmem:[%s1755_s11 + $0x64] ss:$8 sps:$4 sm:$0xff]  }
  0x26   : > { %646 = vmatpush1.bf16.msra.mxu0 %v1481_v6  ;;  %1411 = vmatpush1.bf16.msra.mxu1 %v1481_v6  ;;  %v1525_v41 = vld [vmem:[%s1755_s11 + $0xe4] ss:$8 sps:$4 sm:$0xff]   ;;  %v1527_v42 = vld [vmem:[%s1755_s11 + $0x60] ss:$8 sps:$4 sm:$0xff]   ;;  %v1529_v44 = vld [vmem:[%s1755_s11 + $0x74] ss:$8 sps:$4 sm:$0xff]  }
  0x27   : > { %647 = vmatprep.subr.bf16.mxu0 %v1613_v1  ;;  %1402 = vmatprep.subr.bf16.mxu1 %v1613_v1  ;;  %v1528_v43 = vld [vmem:[%s1755_s11 + $0xe0] ss:$8 sps:$4 sm:$0xff]   ;;  %v1531_v45 = vld [vmem:[%s1755_s11 + $0xf4] ss:$8 sps:$4 sm:$0xff]   ;;  %v1533_v46 = vld [vmem:[%s1755_s11 + $0x70] ss:$8 sps:$4 sm:$0xff]  }
  0x28   : > { %v1534_v47 = vld [vmem:[%s1755_s11 + $0xf0] ss:$8 sps:$4 sm:$0xff]   ;;  %v297_v48 = vld [vmem:[#allocation2] sm:$0xff]  ;;  %v298_v56 = vld [vmem:[#allocation2 + $0x8] sm:$0xff]  ;;  %s1855_s11 = scalar_lea.vmem [#allocation3], %s1263_s10 }
  0x29   : > { %v313_v49 = vld [vmem:[#allocation2 + $0x80] sm:$0xff]  ;;  %v314_v57 = vld [vmem:[#allocation2 + $0x88] sm:$0xff]  ;;  %v299_v0 = vld [vmem:[#allocation2 + $0x10] sm:$0xff]  ;;  %s1145_s19 = sshll.u32 %s1855_s11, 4  ;;  %s1976_s19 = int_to_ptr.vmem [resolvable:$true] %s1145_s19 }
  0x2a   : > { %648 = vmatpush1.bf16.msra.mxu0 %v1482_v9  ;;  %1412 = vmatpush1.bf16.msra.mxu1 %v1482_v9  ;;  %v1843_v2 = vld [vmem:[%s2031_s2] ss:$0 sm:$0xff]  ;;  %v300_v7 = vld [vmem:[#allocation2 + $0x18] sm:$0xff]  ;;  %s1535_s27 = scalar_lea.vmem %s1976_s19, 2048  ;;  %p1542_p1 = scmp.lt.s32.totalorder %s1976_s19, %s1540_s29 }
  0x2b   : > { %649 = vmatprep.subr.bf16.mxu0 %v1613_v1  ;;  %1403 = vmatprep.subr.bf16.mxu1 %v1613_v1  ;;  %v316_v12 = vld [vmem:[#allocation2 + $0x98] sm:$0xff]  ;;  %p1536_p12 = scmp.ne.s32.totalorder %s1976_s19, %s1535_s27  ;;  %p1543_p2 = scmp.lt.s32.totalorder %s1541_s30, %s1535_s27 }
  0x2d   : > { %p1537_p13 = pnand %p1536_p12, %p1679_p4  ;;  %p1544_p3 = por %p1543_p2, %p1542_p1 }
  0x2e   : > { %650 = vmatpush1.bf16.msra.mxu0 %v1483_v10  ;;  %1413 = vmatpush1.bf16.msra.mxu1 %v1483_v10 }
  0x2f   : > { %651 = vmatprep.subr.bf16.mxu0 %v1613_v1  ;;  %1404 = vmatprep.subr.bf16.mxu1 %v1613_v1  ;;  %p1538_p0 = pneg %p1537_p13 }
  0x31   : > { %p1545_p5 = pnand %p1544_p3, %p1538_p0 }
  0x32   : > { %652 = vmatpush1.bf16.msra.mxu0 %v1484_v13  ;;  %1414 = vmatpush1.bf16.msra.mxu1 %v1484_v13 }
  0x33   : > { %665 = vmatprep.subr.bf16.mxu0 %v1613_v1  ;;  %1405 = vmatprep.subr.bf16.mxu1 %v1613_v1 }
  0x36   : > { %666 = vmatpush2.bf16.msra.mxu0 %v635_v16  ;;  %1415 = vmatpush2.bf16.msra.mxu1 %v635_v16 }
  0x37   : > { %667 = vmatprep.subr.bf16.mxu0 %v1613_v1  ;;  %1406 = vmatprep.subr.bf16.mxu1 %v1613_v1  ;;  %v315_v1 = vld [vmem:[#allocation2 + $0x90] sm:$0xff] }
  0x3a   : > { %668 = vmatpush2.bf16.msra.mxu0 %v1486_v17  ;;  %1416 = vmatpush2.bf16.msra.mxu1 %v1486_v17 }
  0x3d   : > { %670 = vmatmul.mubr.bf16.vlgmr.msra.gmra.mxu0 %v1487_v18  ;;  %734 = vmatmul.mubr.bf16.vlgmr.msra.gmra.mxu1 %v1490_v19 }
  0x3e   : > { %1310 = vmatprep.mubr.msk.bf16.mxu0 %vm581_vm1, %v1493_v20  ;;  %1318 = vmatprep.mubr.msk.bf16.mxu1 %vm581_vm1, %v1495_v21  ;;  %v301_v21 = vld [vmem:[#allocation2 + $0x20] sm:$0xff] }
  0x45   : > { %678 = vmatmul.mubr.bf16.gmra.mxu0 %v1497_v22  ;;  %742 = vmatmul.mubr.bf16.gmra.mxu1 %v1498_v23 }
  0x46   : > { %1311 = vmatprep.mubr.msk.bf16.mxu0 %vm581_vm1, %v1499_v24  ;;  %1319 = vmatprep.mubr.msk.bf16.mxu1 %vm581_vm1, %v1501_v25 }
  0x4d   : > { %686 = vmatmul.mubr.bf16.gmra.mxu0 %v1503_v26  ;;  %750 = vmatmul.mubr.bf16.gmra.mxu1 %v1504_v27  ;;  %v317_v26 = vld [vmem:[#allocation2 + $0xa0] sm:$0xff] }
  0x4e   : > { %1312 = vmatprep.mubr.msk.bf16.mxu0 %vm581_vm1, %v1505_v28  ;;  %1320 = vmatprep.mubr.msk.bf16.mxu1 %vm581_vm1, %v1507_v29 }
  0x55   : > { %694 = vmatmul.mubr.bf16.gmra.mxu0 %v1509_v30  ;;  %758 = vmatmul.mubr.bf16.gmra.mxu1 %v1510_v31 }
  0x56   : > { %1313 = vmatprep.mubr.msk.bf16.mxu0 %vm581_vm1, %v1511_v32  ;;  %1321 = vmatprep.mubr.msk.bf16.mxu1 %vm581_vm1, %v1513_v33 }
  0x5d   : > { %702 = vmatmul.mubr.bf16.gmra.mxu0 %v1515_v34  ;;  %766 = vmatmul.mubr.bf16.gmra.mxu1 %v1516_v35 }
  0x5e   : > { %1314 = vmatprep.mubr.msk.bf16.mxu0 %vm581_vm1, %v1517_v36  ;;  %1322 = vmatprep.mubr.msk.bf16.mxu1 %vm581_vm1, %v1519_v37  ;;  %v302_v37 = vld [vmem:[#allocation2 + $0x28] sm:$0xff] }
  0x65   : > { %710 = vmatmul.mubr.bf16.gmra.mxu0 %v1521_v38  ;;  %774 = vmatmul.mubr.bf16.gmra.mxu1 %v1522_v39 }
  0x66   : > { %1315 = vmatprep.mubr.msk.bf16.mxu0 %vm581_vm1, %v1523_v40  ;;  %1323 = vmatprep.mubr.msk.bf16.mxu1 %vm581_vm1, %v1525_v41 }
  0x6d   : > { %718 = vmatmul.mubr.bf16.gmra.mxu0 %v1527_v42  ;;  %782 = vmatmul.mubr.bf16.gmra.mxu1 %v1528_v43  ;;  %v318_v42 = vld [vmem:[#allocation2 + $0xa8] sm:$0xff] }
  0x6e   : > { %1316 = vmatprep.mubr.msk.bf16.mxu0 %vm581_vm1, %v1529_v44  ;;  %1324 = vmatprep.mubr.msk.bf16.mxu1 %vm581_vm1, %v1531_v45 }
  0x75   : > { %726 = vmatmul.mubr.bf16.gmra.mxu0 %v1533_v46  ;;  %790 = vmatmul.mubr.bf16.gmra.mxu1 %v1534_v47 }
  0xfd   : > { %v671_v50 = vpop.f32.mrf.mxu0  ;;  %v735_v51 = vpop.f32.mrf.mxu1 }
  0xfe   : > { %v798_v52 = vadd.f32 %v671_v50, %v297_v48  ;;  %v814_v53 = vadd.f32 %v735_v51, %v313_v49 }
  0xff   : > { %v673_v54 = vpop.f32.mrf.mxu0  ;;  %v737_v55 = vpop.f32.mrf.mxu1 }
 0x100   : > { %831 = vst.msk [vmem:[#allocation2] sm:$0xff] %vm264_vm0, %v798_v52  ;;  %847 = vst.msk [vmem:[#allocation2 + $0x80] sm:$0xff] %vm264_vm0, %v814_v53  ;;  %v303_v53 = vld [vmem:[#allocation2 + $0x30] sm:$0xff] }
 0x101   : > { %v674_v58 = vpop.f32.mrf.mxu0  ;;  %v738_v59 = vpop.f32.mrf.mxu1 }
 0x102   : > { %v799_v60 = vadd.f32 %v674_v58, %v298_v56  ;;  %v815_v61 = vadd.f32 %v738_v59, %v314_v57  ;;  %v319_v58 = vld [vmem:[#allocation2 + $0xb0] sm:$0xff] }
 0x103   : > { %v676_v62 = vpop.f32.mrf.mxu0  ;;  %v740_v63 = vpop.f32.mrf.mxu1 }
 0x104   : > { %832 = vst.msk [vmem:[#allocation2 + $0x8] sm:$0xff] %vm264_vm0, %v799_v60  ;;  %848 = vst.msk [vmem:[#allocation2 + $0x88] sm:$0xff] %vm264_vm0, %v815_v61 }
 0x105   : > { %v679_v3 = vpop.f32.mrf.mxu0  ;;  %v743_v4 = vpop.f32.mrf.mxu1 }
 0x106   : > { %v800_v5 = vadd.f32 %v679_v3, %v299_v0  ;;  %v816_v6 = vadd.f32 %v743_v4, %v315_v1 }
 0x107   : > { %v866_v8 = vld [vmem:[#allocation2] sm:$0xff]  ;;  %v681_v10 = vpop.f32.mrf.mxu0  ;;  %v745_v11 = vpop.f32.mrf.mxu1 }
 0x108   : > { %v882_v9 = vld [vmem:[#allocation2 + $0x80] sm:$0xff]  ;;  %v905_v13 = vadd.f32 %v1843_v2, %v866_v8  ;;  %833 = vst.msk [vmem:[#allocation2 + $0x10] sm:$0xff] %vm264_vm0, %v800_v5  ;;  %849 = vst.msk [vmem:[#allocation2 + $0x90] sm:$0xff] %vm264_vm0, %v816_v6  ;;  %v304_v6 = vld [vmem:[#allocation2 + $0x38] sm:$0xff] }
 0x109   : > { %v921_v14 = vadd.f32 %v1843_v2, %v882_v9  ;;  %v682_v15 = vpop.f32.mrf.mxu0  ;;  %v746_v16 = vpop.f32.mrf.mxu1  ;;  %v320_v11 = vld [vmem:[#allocation2 + $0xb8] sm:$0xff] }
 0x10a   : > { %v937_v17 = vmax.f32 %v905_v13, 0.0  ;;  %v801_v19 = vadd.f32 %v682_v15, %v300_v7  ;;  %v817_v20 = vadd.f32 %v746_v16, %v316_v12 }
 0x10b   : > { %v953_v18 = vmax.f32 %v921_v14, 0.0  ;;  %v867_v22 = vld [vmem:[#allocation2 + $0x8] sm:$0xff]  ;;  %v684_v24 = vpop.f32.mrf.mxu0  ;;  %v748_v25 = vpop.f32.mrf.mxu1 }
 0x10c   : > { %v883_v23 = vld [vmem:[#allocation2 + $0x88] sm:$0xff]  ;;  %v1364_v27 = vpack.c.bf16 %v937_v17, %v937_v17  ;;  %v906_v29 = vadd.f32 %v1843_v2, %v867_v22  ;;  %834 = vst.msk [vmem:[#allocation2 + $0x18] sm:$0xff] %vm264_vm0, %v801_v19  ;;  %850 = vst.msk [vmem:[#allocation2 + $0x98] sm:$0xff] %vm264_vm0, %v817_v20  ;;  %v305_v22 = vld [vmem:[#allocation2 + $0x40] sm:$0xff] }
 0x10d   : > { %v1380_v28 = vpack.c.bf16 %v953_v18, %v953_v18  ;;  %v922_v30 = vadd.f32 %v1843_v2, %v883_v23  ;;  %v687_v31 = vpop.f32.mrf.mxu0  ;;  %v751_v32 = vpop.f32.mrf.mxu1 }
 0x10e   : > { %1098 = vst.msk [vmem:[%s1855_s11] sm:$0xf] %vm1097_vm4, %v1364_v27  ;;  %v938_v33 = vmax.f32 %v906_v29, 0.0  ;;  %v802_v35 = vadd.f32 %v687_v31, %v301_v21  ;;  %v818_v36 = vadd.f32 %v751_v32, %v317_v26  ;;  %v321_v27 = vld [vmem:[#allocation2 + $0xc0] sm:$0xff] }
 0x10f   : > { %1114 = vst.msk [vmem:[%s1855_s11 + $0x40] sm:$0xf] %vm1097_vm4, %v1380_v28  ;;  %v954_v34 = vmax.f32 %v922_v30, 0.0  ;;  %v868_v38 = vld [vmem:[#allocation2 + $0x10] sm:$0xff]  ;;  %v689_v40 = vpop.f32.mrf.mxu0  ;;  %v753_v41 = vpop.f32.mrf.mxu1 }
 0x110   : > { %v884_v39 = vld [vmem:[#allocation2 + $0x90] sm:$0xff]  ;;  %v1365_v43 = vpack.c.bf16 %v938_v33, %v938_v33  ;;  %v907_v45 = vadd.f32 %v1843_v2, %v868_v38  ;;  %835 = vst.msk [vmem:[#allocation2 + $0x20] sm:$0xff] %vm264_vm0, %v802_v35  ;;  %851 = vst.msk [vmem:[#allocation2 + $0xa0] sm:$0xff] %vm264_vm0, %v818_v36  ;;  %v306_v38 = vld [vmem:[#allocation2 + $0x48] sm:$0xff] }
 0x111   : > { %v1381_v44 = vpack.c.bf16 %v954_v34, %v954_v34  ;;  %v923_v46 = vadd.f32 %v1843_v2, %v884_v39  ;;  %v690_v47 = vpop.f32.mrf.mxu0  ;;  %v754_v48 = vpop.f32.mrf.mxu1 }
 0x112   : > { %1099 = vst.msk [vmem:[%s1855_s11 + $0x4] sm:$0xf] %vm1097_vm4, %v1365_v43  ;;  %v939_v49 = vmax.f32 %v907_v45, 0.0  ;;  %v803_v51 = vadd.f32 %v690_v47, %v302_v37  ;;  %v819_v52 = vadd.f32 %v754_v48, %v318_v42  ;;  %v322_v43 = vld [vmem:[#allocation2 + $0xc8] sm:$0xff] }
 0x113   : > { %1115 = vst.msk [vmem:[%s1855_s11 + $0x44] sm:$0xf] %vm1097_vm4, %v1381_v44  ;;  %v955_v50 = vmax.f32 %v923_v46, 0.0  ;;  %v869_v54 = vld [vmem:[#allocation2 + $0x18] sm:$0xff]  ;;  %v692_v56 = vpop.f32.mrf.mxu0  ;;  %v756_v57 = vpop.f32.mrf.mxu1 }
 0x114   : > { %v885_v55 = vld [vmem:[#allocation2 + $0x98] sm:$0xff]  ;;  %v1366_v59 = vpack.c.bf16 %v939_v49, %v939_v49  ;;  %v908_v61 = vadd.f32 %v1843_v2, %v869_v54  ;;  %836 = vst.msk [vmem:[#allocation2 + $0x28] sm:$0xff] %vm264_vm0, %v803_v51  ;;  %852 = vst.msk [vmem:[#allocation2 + $0xa8] sm:$0xff] %vm264_vm0, %v819_v52  ;;  %v307_v54 = vld [vmem:[#allocation2 + $0x50] sm:$0xff] }
 0x115   : > { %v1382_v60 = vpack.c.bf16 %v955_v50, %v955_v50  ;;  %v924_v62 = vadd.f32 %v1843_v2, %v885_v55  ;;  %v695_v63 = vpop.f32.mrf.mxu0  ;;  %v759_v0 = vpop.f32.mrf.mxu1 }
 0x116   : > { %1100 = vst.msk [vmem:[%s1855_s11 + $0x8] sm:$0xf] %vm1097_vm4, %v1366_v59  ;;  %v940_v1 = vmax.f32 %v908_v61, 0.0  ;;  %v804_v4 = vadd.f32 %v695_v63, %v303_v53  ;;  %v820_v5 = vadd.f32 %v759_v0, %v319_v58  ;;  %v323_v59 = vld [vmem:[#allocation2 + $0xd0] sm:$0xff] }
 0x117   : > { %1116 = vst.msk [vmem:[%s1855_s11 + $0x48] sm:$0xf] %vm1097_vm4, %v1382_v60  ;;  %v956_v3 = vmax.f32 %v924_v62, 0.0  ;;  %v870_v7 = vld [vmem:[#allocation2 + $0x20] sm:$0xff]  ;;  %v697_v9 = vpop.f32.mrf.mxu0  ;;  %v761_v10 = vpop.f32.mrf.mxu1 }
 0x118   : > { %v886_v8 = vld [vmem:[#allocation2 + $0xa0] sm:$0xff]  ;;  %v1367_v12 = vpack.c.bf16 %v940_v1, %v940_v1  ;;  %v909_v14 = vadd.f32 %v1843_v2, %v870_v7  ;;  %837 = vst.msk [vmem:[#allocation2 + $0x30] sm:$0xff] %vm264_vm0, %v804_v4  ;;  %853 = vst.msk [vmem:[#allocation2 + $0xb0] sm:$0xff] %vm264_vm0, %v820_v5  ;;  %v308_v7 = vld [vmem:[#allocation2 + $0x58] sm:$0xff] }
 0x119   : > { %v1383_v13 = vpack.c.bf16 %v956_v3, %v956_v3  ;;  %v925_v15 = vadd.f32 %v1843_v2, %v886_v8  ;;  %v698_v16 = vpop.f32.mrf.mxu0  ;;  %v762_v17 = vpop.f32.mrf.mxu1 }
 0x11a   : > { %1101 = vst.msk [vmem:[%s1855_s11 + $0xc] sm:$0xf] %vm1097_vm4, %v1367_v12  ;;  %v941_v18 = vmax.f32 %v909_v14, 0.0  ;;  %v805_v20 = vadd.f32 %v698_v16, %v304_v6  ;;  %v821_v21 = vadd.f32 %v762_v17, %v320_v11  ;;  %v324_v12 = vld [vmem:[#allocation2 + $0xd8] sm:$0xff] }
 0x11b   : > { %1117 = vst.msk [vmem:[%s1855_s11 + $0x4c] sm:$0xf] %vm1097_vm4, %v1383_v13  ;;  %v957_v19 = vmax.f32 %v925_v15, 0.0  ;;  %v871_v23 = vld [vmem:[#allocation2 + $0x28] sm:$0xff]  ;;  %v700_v25 = vpop.f32.mrf.mxu0  ;;  %v764_v26 = vpop.f32.mrf.mxu1 }
 0x11c   : > { %v887_v24 = vld [vmem:[#allocation2 + $0xa8] sm:$0xff]  ;;  %v1368_v28 = vpack.c.bf16 %v941_v18, %v941_v18  ;;  %v910_v30 = vadd.f32 %v1843_v2, %v871_v23  ;;  %838 = vst.msk [vmem:[#allocation2 + $0x38] sm:$0xff] %vm264_vm0, %v805_v20  ;;  %854 = vst.msk [vmem:[#allocation2 + $0xb8] sm:$0xff] %vm264_vm0, %v821_v21  ;;  %v309_v23 = vld [vmem:[#allocation2 + $0x60] sm:$0xff] }
 0x11d   : > { %v1384_v29 = vpack.c.bf16 %v957_v19, %v957_v19  ;;  %v926_v31 = vadd.f32 %v1843_v2, %v887_v24  ;;  %v703_v32 = vpop.f32.mrf.mxu0  ;;  %v767_v33 = vpop.f32.mrf.mxu1 }
 0x11e   : > { %1102 = vst.msk [vmem:[%s1855_s11 + $0x10] sm:$0xf] %vm1097_vm4, %v1368_v28  ;;  %v942_v34 = vmax.f32 %v910_v30, 0.0  ;;  %v806_v36 = vadd.f32 %v703_v32, %v305_v22  ;;  %v822_v37 = vadd.f32 %v767_v33, %v321_v27  ;;  %v325_v28 = vld [vmem:[#allocation2 + $0xe0] sm:$0xff] }
 0x11f   : > { %1118 = vst.msk [vmem:[%s1855_s11 + $0x50] sm:$0xf] %vm1097_vm4, %v1384_v29  ;;  %v958_v35 = vmax.f32 %v926_v31, 0.0  ;;  %v872_v39 = vld [vmem:[#allocation2 + $0x30] sm:$0xff]  ;;  %v705_v41 = vpop.f32.mrf.mxu0  ;;  %v769_v42 = vpop.f32.mrf.mxu1 }
 0x120   : > { %v888_v40 = vld [vmem:[#allocation2 + $0xb0] sm:$0xff]  ;;  %v1369_v44 = vpack.c.bf16 %v942_v34, %v942_v34  ;;  %v911_v46 = vadd.f32 %v1843_v2, %v872_v39  ;;  %839 = vst.msk [vmem:[#allocation2 + $0x40] sm:$0xff] %vm264_vm0, %v806_v36  ;;  %855 = vst.msk [vmem:[#allocation2 + $0xc0] sm:$0xff] %vm264_vm0, %v822_v37  ;;  %v310_v39 = vld [vmem:[#allocation2 + $0x68] sm:$0xff] }
 0x121   : > { %v1385_v45 = vpack.c.bf16 %v958_v35, %v958_v35  ;;  %v927_v47 = vadd.f32 %v1843_v2, %v888_v40  ;;  %v706_v48 = vpop.f32.mrf.mxu0  ;;  %v770_v49 = vpop.f32.mrf.mxu1 }
 0x122   : > { %1103 = vst.msk [vmem:[%s1855_s11 + $0x14] sm:$0xf] %vm1097_vm4, %v1369_v44  ;;  %v943_v50 = vmax.f32 %v911_v46, 0.0  ;;  %v807_v52 = vadd.f32 %v706_v48, %v306_v38  ;;  %v823_v53 = vadd.f32 %v770_v49, %v322_v43  ;;  %v326_v44 = vld [vmem:[#allocation2 + $0xe8] sm:$0xff] }
 0x123   : > { %1119 = vst.msk [vmem:[%s1855_s11 + $0x54] sm:$0xf] %vm1097_vm4, %v1385_v45  ;;  %v959_v51 = vmax.f32 %v927_v47, 0.0  ;;  %v873_v55 = vld [vmem:[#allocation2 + $0x38] sm:$0xff]  ;;  %v708_v57 = vpop.f32.mrf.mxu0  ;;  %v772_v58 = vpop.f32.mrf.mxu1 }
 0x124   : > { %v889_v56 = vld [vmem:[#allocation2 + $0xb8] sm:$0xff]  ;;  %v1370_v60 = vpack.c.bf16 %v943_v50, %v943_v50  ;;  %v912_v62 = vadd.f32 %v1843_v2, %v873_v55  ;;  %840 = vst.msk [vmem:[#allocation2 + $0x48] sm:$0xff] %vm264_vm0, %v807_v52  ;;  %856 = vst.msk [vmem:[#allocation2 + $0xc8] sm:$0xff] %vm264_vm0, %v823_v53  ;;  %v311_v55 = vld [vmem:[#allocation2 + $0x70] sm:$0xff] }
 0x125   : > { %v1386_v61 = vpack.c.bf16 %v959_v51, %v959_v51  ;;  %v928_v63 = vadd.f32 %v1843_v2, %v889_v56  ;;  %v711_v0 = vpop.f32.mrf.mxu0  ;;  %v775_v1 = vpop.f32.mrf.mxu1 }
 0x126   : > { %1104 = vst.msk [vmem:[%s1855_s11 + $0x18] sm:$0xf] %vm1097_vm4, %v1370_v60  ;;  %v944_v3 = vmax.f32 %v912_v62, 0.0  ;;  %v808_v5 = vadd.f32 %v711_v0, %v307_v54  ;;  %v824_v6 = vadd.f32 %v775_v1, %v323_v59  ;;  %v327_v60 = vld [vmem:[#allocation2 + $0xf0] sm:$0xff] }
 0x127   : > { %1120 = vst.msk [vmem:[%s1855_s11 + $0x58] sm:$0xf] %vm1097_vm4, %v1386_v61  ;;  %v960_v4 = vmax.f32 %v928_v63, 0.0  ;;  %v874_v8 = vld [vmem:[#allocation2 + $0x40] sm:$0xff]  ;;  %v713_v10 = vpop.f32.mrf.mxu0  ;;  %v777_v11 = vpop.f32.mrf.mxu1 }
 0x128   : > { %v890_v9 = vld [vmem:[#allocation2 + $0xc0] sm:$0xff]  ;;  %v1371_v13 = vpack.c.bf16 %v944_v3, %v944_v3  ;;  %v913_v15 = vadd.f32 %v1843_v2, %v874_v8  ;;  %841 = vst.msk [vmem:[#allocation2 + $0x50] sm:$0xff] %vm264_vm0, %v808_v5  ;;  %857 = vst.msk [vmem:[#allocation2 + $0xd0] sm:$0xff] %vm264_vm0, %v824_v6  ;;  %v312_v8 = vld [vmem:[#allocation2 + $0x78] sm:$0xff] }
 0x129   : > { %v1387_v14 = vpack.c.bf16 %v960_v4, %v960_v4  ;;  %v929_v16 = vadd.f32 %v1843_v2, %v890_v9  ;;  %v714_v17 = vpop.f32.mrf.mxu0  ;;  %v778_v18 = vpop.f32.mrf.mxu1 }
 0x12a   : > { %1105 = vst.msk [vmem:[%s1855_s11 + $0x1c] sm:$0xf] %vm1097_vm4, %v1371_v13  ;;  %v945_v19 = vmax.f32 %v913_v15, 0.0  ;;  %v809_v21 = vadd.f32 %v714_v17, %v308_v7  ;;  %v825_v22 = vadd.f32 %v778_v18, %v324_v12  ;;  %v328_v13 = vld [vmem:[#allocation2 + $0xf8] sm:$0xff] }
 0x12b   : > { %1121 = vst.msk [vmem:[%s1855_s11 + $0x5c] sm:$0xf] %vm1097_vm4, %v1387_v14  ;;  %v961_v20 = vmax.f32 %v929_v16, 0.0  ;;  %v875_v24 = vld [vmem:[#allocation2 + $0x48] sm:$0xff]  ;;  %v716_v26 = vpop.f32.mrf.mxu0  ;;  %v780_v27 = vpop.f32.mrf.mxu1 }
 0x12c   : > { %v891_v25 = vld [vmem:[#allocation2 + $0xc8] sm:$0xff]  ;;  %v1372_v29 = vpack.c.bf16 %v945_v19, %v945_v19  ;;  %v914_v31 = vadd.f32 %v1843_v2, %v875_v24  ;;  %842 = vst.msk [vmem:[#allocation2 + $0x58] sm:$0xff] %vm264_vm0, %v809_v21  ;;  %858 = vst.msk [vmem:[#allocation2 + $0xd8] sm:$0xff] %vm264_vm0, %v825_v22 }
 0x12d   : > { %v1388_v30 = vpack.c.bf16 %v961_v20, %v961_v20  ;;  %v930_v32 = vadd.f32 %v1843_v2, %v891_v25  ;;  %v719_v33 = vpop.f32.mrf.mxu0  ;;  %v783_v34 = vpop.f32.mrf.mxu1 }
 0x12e   : > { %1106 = vst.msk [vmem:[%s1855_s11 + $0x20] sm:$0xf] %vm1097_vm4, %v1372_v29  ;;  %v946_v35 = vmax.f32 %v914_v31, 0.0  ;;  %v810_v37 = vadd.f32 %v719_v33, %v309_v23  ;;  %v826_v38 = vadd.f32 %v783_v34, %v325_v28 }
 0x12f   : > { %1122 = vst.msk [vmem:[%s1855_s11 + $0x60] sm:$0xf] %vm1097_vm4, %v1388_v30  ;;  %v962_v36 = vmax.f32 %v930_v32, 0.0  ;;  %v876_v40 = vld [vmem:[#allocation2 + $0x50] sm:$0xff]  ;;  %v721_v42 = vpop.f32.mrf.mxu0  ;;  %v785_v43 = vpop.f32.mrf.mxu1 }
 0x130   : > { %v892_v41 = vld [vmem:[#allocation2 + $0xd0] sm:$0xff]  ;;  %v1373_v45 = vpack.c.bf16 %v946_v35, %v946_v35  ;;  %v915_v47 = vadd.f32 %v1843_v2, %v876_v40  ;;  %843 = vst.msk [vmem:[#allocation2 + $0x60] sm:$0xff] %vm264_vm0, %v810_v37  ;;  %859 = vst.msk [vmem:[#allocation2 + $0xe0] sm:$0xff] %vm264_vm0, %v826_v38 }
 0x131   : > { %v1389_v46 = vpack.c.bf16 %v962_v36, %v962_v36  ;;  %v931_v48 = vadd.f32 %v1843_v2, %v892_v41  ;;  %v722_v49 = vpop.f32.mrf.mxu0  ;;  %v786_v50 = vpop.f32.mrf.mxu1 }
 0x132   : > { %1107 = vst.msk [vmem:[%s1855_s11 + $0x24] sm:$0xf] %vm1097_vm4, %v1373_v45  ;;  %v947_v51 = vmax.f32 %v915_v47, 0.0  ;;  %v811_v53 = vadd.f32 %v722_v49, %v310_v39  ;;  %v827_v54 = vadd.f32 %v786_v50, %v326_v44 }
 0x133   : > { %1123 = vst.msk [vmem:[%s1855_s11 + $0x64] sm:$0xf] %vm1097_vm4, %v1389_v46  ;;  %v963_v52 = vmax.f32 %v931_v48, 0.0  ;;  %v877_v56 = vld [vmem:[#allocation2 + $0x58] sm:$0xff]  ;;  %v724_v58 = vpop.f32.mrf.mxu0  ;;  %v788_v59 = vpop.f32.mrf.mxu1 }
 0x134   : > { %v893_v57 = vld [vmem:[#allocation2 + $0xd8] sm:$0xff]  ;;  %v1374_v61 = vpack.c.bf16 %v947_v51, %v947_v51  ;;  %v916_v63 = vadd.f32 %v1843_v2, %v877_v56  ;;  %844 = vst.msk [vmem:[#allocation2 + $0x68] sm:$0xff] %vm264_vm0, %v811_v53  ;;  %860 = vst.msk [vmem:[#allocation2 + $0xe8] sm:$0xff] %vm264_vm0, %v827_v54 }
 0x135   : > { %v1390_v62 = vpack.c.bf16 %v963_v52, %v963_v52  ;;  %v932_v0 = vadd.f32 %v1843_v2, %v893_v57  ;;  %v727_v1 = vpop.f32.mrf.mxu0  ;;  %v791_v3 = vpop.f32.mrf.mxu1 }
 0x136   : > { %1108 = vst.msk [vmem:[%s1855_s11 + $0x28] sm:$0xf] %vm1097_vm4, %v1374_v61  ;;  %v948_v4 = vmax.f32 %v916_v63, 0.0  ;;  %v812_v6 = vadd.f32 %v727_v1, %v311_v55  ;;  %v828_v7 = vadd.f32 %v791_v3, %v327_v60 }
 0x137   : > { %1124 = vst.msk [vmem:[%s1855_s11 + $0x68] sm:$0xf] %vm1097_vm4, %v1390_v62  ;;  %v964_v5 = vmax.f32 %v932_v0, 0.0  ;;  %v878_v9 = vld [vmem:[#allocation2 + $0x60] sm:$0xff]  ;;  %v729_v11 = vpop.f32.mrf.mxu0  ;;  %v793_v12 = vpop.f32.mrf.mxu1 }
 0x138   : > { %v894_v10 = vld [vmem:[#allocation2 + $0xe0] sm:$0xff]  ;;  %v1375_v14 = vpack.c.bf16 %v948_v4, %v948_v4  ;;  %v917_v16 = vadd.f32 %v1843_v2, %v878_v9  ;;  %845 = vst.msk [vmem:[#allocation2 + $0x70] sm:$0xff] %vm264_vm0, %v812_v6  ;;  %861 = vst.msk [vmem:[#allocation2 + $0xf0] sm:$0xff] %vm264_vm0, %v828_v7 }
 0x139   : > { %v1391_v15 = vpack.c.bf16 %v964_v5, %v964_v5  ;;  %v933_v17 = vadd.f32 %v1843_v2, %v894_v10  ;;  %v730_v18 = vpop.f32.mrf.mxu0  ;;  %v794_v19 = vpop.f32.mrf.mxu1 }
 0x13a   : > { %1109 = vst.msk [vmem:[%s1855_s11 + $0x2c] sm:$0xf] %vm1097_vm4, %v1375_v14  ;;  %v949_v20 = vmax.f32 %v917_v16, 0.0  ;;  %v813_v22 = vadd.f32 %v730_v18, %v312_v8  ;;  %v829_v23 = vadd.f32 %v794_v19, %v328_v13 }
 0x13b   : > { %1125 = vst.msk [vmem:[%s1855_s11 + $0x6c] sm:$0xf] %vm1097_vm4, %v1391_v15  ;;  %v965_v21 = vmax.f32 %v933_v17, 0.0  ;;  %v879_v24 = vld [vmem:[#allocation2 + $0x68] sm:$0xff]  ;;  %v732_v26 = vpop.f32.mrf.mxu0  ;;  %v796_v27 = vpop.f32.mrf.mxu1 }
 0x13c   : > { %v895_v25 = vld [vmem:[#allocation2 + $0xe8] sm:$0xff]  ;;  %v1376_v28 = vpack.c.bf16 %v949_v20, %v949_v20  ;;  %v918_v30 = vadd.f32 %v1843_v2, %v879_v24  ;;  %846 = vst.msk [vmem:[#allocation2 + $0x78] sm:$0xff] %vm264_vm0, %v813_v22  ;;  %862 = vst.msk [vmem:[#allocation2 + $0xf8] sm:$0xff] %vm264_vm0, %v829_v23 }
 0x13d   : > { %v1392_v29 = vpack.c.bf16 %v965_v21, %v965_v21  ;;  %v934_v31 = vadd.f32 %v1843_v2, %v895_v25 }
 0x13e   : > { %1110 = vst.msk [vmem:[%s1855_s11 + $0x30] sm:$0xf] %vm1097_vm4, %v1376_v28  ;;  %v950_v32 = vmax.f32 %v918_v30, 0.0 }
 0x13f   : > { %1126 = vst.msk [vmem:[%s1855_s11 + $0x70] sm:$0xf] %vm1097_vm4, %v1392_v29  ;;  %v966_v33 = vmax.f32 %v934_v31, 0.0  ;;  %v880_v34 = vld [vmem:[#allocation2 + $0x70] sm:$0xff] }
 0x140   : > { %v896_v35 = vld [vmem:[#allocation2 + $0xf0] sm:$0xff]  ;;  %v1377_v36 = vpack.c.bf16 %v950_v32, %v950_v32  ;;  %v919_v38 = vadd.f32 %v1843_v2, %v880_v34 }
 0x141   : > { %v1393_v37 = vpack.c.bf16 %v966_v33, %v966_v33  ;;  %v935_v39 = vadd.f32 %v1843_v2, %v896_v35 }
 0x142   : > { %1111 = vst.msk [vmem:[%s1855_s11 + $0x34] sm:$0xf] %vm1097_vm4, %v1377_v36  ;;  %v951_v40 = vmax.f32 %v919_v38, 0.0 }
 0x143   : > { %1127 = vst.msk [vmem:[%s1855_s11 + $0x74] sm:$0xf] %vm1097_vm4, %v1393_v37  ;;  %v967_v41 = vmax.f32 %v935_v39, 0.0  ;;  %v881_v42 = vld [vmem:[#allocation2 + $0x78] sm:$0xff] }
 0x144   : > { %v897_v43 = vld [vmem:[#allocation2 + $0xf8] sm:$0xff]  ;;  %v1378_v44 = vpack.c.bf16 %v951_v40, %v951_v40  ;;  %v920_v46 = vadd.f32 %v1843_v2, %v881_v42 }
 0x145   : > { %v1394_v45 = vpack.c.bf16 %v967_v41, %v967_v41  ;;  %v936_v47 = vadd.f32 %v1843_v2, %v897_v43 }
 0x146   : > { %1112 = vst.msk [vmem:[%s1855_s11 + $0x38] sm:$0xf] %vm1097_vm4, %v1378_v44  ;;  %v952_v48 = vmax.f32 %v920_v46, 0.0 }
 0x147   : > { %1128 = vst.msk [vmem:[%s1855_s11 + $0x78] sm:$0xf] %vm1097_vm4, %v1394_v45  ;;  %v968_v49 = vmax.f32 %v936_v47, 0.0 }
 0x148   : > { %v1379_v2 = vpack.c.bf16 %v952_v48, %v952_v48 }
 0x149   : > { %v1395_v50 = vpack.c.bf16 %v968_v49, %v968_v49 }
 0x14a   : > { %1113 = vst.msk [vmem:[%s1855_s11 + $0x3c] sm:$0xf] %vm1097_vm4, %v1379_v2 }
 0x14b   : > { %1129 = vst.msk [vmem:[%s1855_s11 + $0x7c] sm:$0xf] %vm1097_vm4, %v1395_v50 }
 0x14c   : > { %1548 = shalt.err (!%p1545_p5)
}
 0x14d   : > { %s1549_s4 = scalar_lea.hbm %s1974_s26, 2048  ;;  %s1553_s7 = scalar_lea.hbm %s2032_s3, 4096 }
 0x14e   : > { %p1550_p6 = scmp.ne.s32.totalorder %s1974_s26, %s1549_s4  ;;  %p1554_p10 = scmp.lt.s32.totalorder %s1974_s26, %s2032_s3 }
 0x14f   : > { %p1555_p11 = scmp.lt.s32.totalorder %s1553_s7, %s1549_s4 }
 0x150   : > { %p1551_p7 = pnand %p1550_p6, %p1679_p4 }
 0x151   : > { %p1556_p12 = por %p1555_p11, %p1554_p10 }
 0x152   : > { %p1552_p9 = pneg %p1551_p7 }
 0x154   : > { %p1557_p13 = pnand %p1556_p12, %p1552_p9 }
 0x156   : > { %1560 = shalt.err (!%p1557_p13)
}
 0x157   : > { %s1617_s10 = smov 64   ;;  %s1618_s11 = smov 4  }
 0x158   : > { %1417 = dma.vmem_to_hbm [thread:$0]  (%p1679_p4), %s1976_s19, 2048, %s1974_s26, %s1984_s15, %s1617_s10, %s1617_s10, %s1618_s11  }
 0x159 PF: > { %p1423_p0 = scmp.ge.s32.totalorder %s1611_s17, 2  ;;  %s1160_s18 = sand.u32 1, %s1591_s12  }
 0x15a   : > { %s1161_s21 = scalar_lea.sflag [#allocation4], %s1160_s18 }
 0x15b   : > { %p1420_p1 = pnand %p1423_p0, %p1686_p8 }
 0x15d   : > { %p1421_p2 = pneg %p1420_p1 }
 0x15f   : > { %1586 = dma.done.wait (%p1421_p2), %s1161_s21, 2048  }
 0x160   : > { %1588 = vsyncadd (%p1421_p2), %s1161_s21, 4294965248  ;;  %s16_s17 = sadd.s32 1, %s1611_s17   ;;  %s2035_s12 = smov %s1595_s13 }
 0x161   : > { %p13_p3 = scmp.ge.s32.totalorder %s16_s17, 4   ;;  %s2036_s13 = smov %s1599_s14 }
 0x162   : > { %s2037_s14 = smov %s1692_s25  ;;  %s2038_s15 = smov %s1607_s16 }
 0x163   : > { %s2039_s16 = smov %s2041_s20  ;;  %15 = sbr.rel (!%p13_p3) target bundleno = 4 (0x4), region = 81 }
 0x168   :  { %1166 = vsyncpa [#allocation4], 1 }
 0x169   :  { %1168 = vsyncpa [#allocation4 + $0x1], 1 }

</bundles_post_ra>
